<compile_context>
chip_gen: v7x
topology: tpu7x:2x2x1
jax: 0.10.0
libtpu: 0.0.40
codegen_flags: <defaults>
</compile_context>

<pallas_src>
import math

import jax
import jax.numpy as jnp
from jax import lax
from jax.experimental import pallas as pl
from jax.experimental.pallas import tpu as pltpu


# --------------------------------------------------------------------------- #
# Kernel: per (view, batch-tile) step                                          #
# --------------------------------------------------------------------------- #
def _msn_anchor_kernel(anchors_ref, q_ref, ps_ref, ce_ref, colsum_ref):
    # l2-normalize the anchor tile in f32 (matches F.normalize(dim=1), eps=1e-12:
    # 1/max(||x||, 1e-12) == rsqrt(max(sum(x^2), 1e-24)))
    a = anchors_ref[0].astype(jnp.float32)                      # (tile_b, D)
    ss = jnp.sum(a * a, axis=1, keepdims=True)
    a = a * lax.rsqrt(jnp.maximum(ss, 1e-24))

    # bf16 MXU matmul with f32 accumulation; ps is (D, P) with 1/temperature folded.
    logits = jnp.dot(a.astype(jnp.bfloat16), ps_ref[...],
                     preferred_element_type=jnp.float32)        # (tile_b, P)

    # analytic log-softmax: a single exp pass over the (tile_b, P) tile
    s = logits - jnp.max(logits, axis=1, keepdims=True)
    e = jnp.exp(s)
    denom = jnp.sum(e, axis=1, keepdims=True)                   # (tile_b, 1)
    log_ap = s - jnp.log(denom)
    probs = e * (1.0 / denom)

    # per-tile partial column sums (for the mean-entropy regularizer)
    colsum_ref[0] = jnp.sum(probs, axis=0, keepdims=True)       # (1, P)

    # per-tile cross-entropy partial: -sum(q * log_ap) over this tile
    q = q_ref[...].astype(jnp.float32)                          # (tile_b, P)
    ce = jnp.sum(-(q * log_ap), axis=0, keepdims=True)          # (1, P)
    ce = jnp.sum(ce, axis=1, keepdims=True)                     # (1, 1)
    ce_ref[0] = jnp.broadcast_to(ce, (1, 128))                  # lane-dense write


# --------------------------------------------------------------------------- #
# Wrapper helpers                                                              #
# --------------------------------------------------------------------------- #
def _normalize_rows(x):
    n = jnp.linalg.norm(x, axis=1, keepdims=True)
    return x / jnp.maximum(n, 1e-12)


def _target_q(targets, prototypes_normed, temperature, sharpen_temperature,
              sinkhorn_iterations):
    """no_grad target branch in plain XLA (f32): softmax -> sharpen -> sinkhorn."""
    t = _normalize_rows(targets)
    tl = (t @ prototypes_normed.T) / temperature                # (B, P)
    tp = jax.nn.softmax(tl, axis=1)
    tp = tp ** (1.0 / sharpen_temperature)
    tp = tp / jnp.sum(tp, axis=1, keepdims=True)
    if sinkhorn_iterations <= 0:
        return tp
    B, P = tp.shape
    q = tp / jnp.sum(tp)
    for _ in range(sinkhorn_iterations):
        q = q / (jnp.sum(q, axis=0, keepdims=True) * float(P))
        q = q / (jnp.sum(q, axis=1, keepdims=True) * float(B))
    return q * float(B)


def _physical_vmem_bytes(default=128 << 20):
    try:
        info = pltpu.get_tpu_info()
        return int(getattr(info, "vmem_capacity_bytes", default)) or default
    except Exception:
        return default


def _pick_tile_rows(B, P, max_rows_cap=1024):
    """Largest B-divisor tile that keeps the live (tile, P) f32 intermediates in
    VMEM, preferring MXU-shaped multiples (256, then 128, then 8)."""
    if B % 8 != 0:
        return B                                   # full-dim block: always legal
    phys = _physical_vmem_bytes()
    budget = max(8 << 20, phys // 4)               # budget for the live temporaries
    cap = budget // (6 * 4 * max(P, 128))          # ~6 live (tile, P) f32 arrays
    cap = max(8, min(cap, B, max_rows_cap))
    for pref in (256, 128, 8):
        t = (cap // pref) * pref
        while t >= pref:
            if B % t == 0:
                return t
            t -= pref
    return B


def _vmem_limit_bytes(tile_b, B, P, D):
    def rup(x, m):
        return -(-x // m) * m

    f32, bf16 = 4, 2
    Pp, Dp = rup(P, 128), rup(D, 128)
    tb = rup(tile_b, 8)
    # double-buffered pipelined inputs (anchors f32, q bf16) + resident bf16 protos
    inputs = 2 * (tb * Dp * f32 + tb * Pp * bf16 + Dp * Pp * bf16)
    # ~6 live (tile_b, P) f32 intermediates (logits, s, e, log_ap, probs, q_f32)
    work = 6 * tb * Pp * f32
    outs = 2 * 2 * (Pp + 128) * f32
    total = inputs + work + outs + (4 << 20)       # Mosaic internal-scratch slack
    phys = _physical_vmem_bytes()
    cap = max(24 << 20, phys - (8 << 20))          # never request 100% of VMEM
    return int(min(max(total, 24 << 20), cap))


def _part_index(num_b_tiles):
    return lambda v, b: (v * num_b_tiles + b, 0, 0)


# --------------------------------------------------------------------------- #
# Public entry point                                                           #
# --------------------------------------------------------------------------- #
def msn_loss(anchors, targets, prototypes, *,
             temperature=0.1, sinkhorn_iterations=3, regularization_weight=1.0,
             target_sharpen_temperature=0.25, tile_rows=None):
    A, D = anchors.shape
    B, Dt = targets.shape
    P, Dp = prototypes.shape
    assert D == Dt == Dp, "feature dims must match"
    assert A % B == 0, "anchors must be (batch * views, dim)"
    num_views = A // B

    # ---- target branch (torch.no_grad) precomputed in plain XLA, f32 ----
    protos_n = _normalize_rows(prototypes.astype(jnp.float32))            # (P, D)
    q = _target_q(targets.astype(jnp.float32), protos_n, float(temperature),
                  float(target_sharpen_temperature), int(sinkhorn_iterations))
    q_bf16 = q.astype(jnp.bfloat16)                                       # (B, P)

    # ---- MXU-friendly prototype operand: (D, P), 1/temperature folded, bf16 ----
    ps_t = (protos_n * (1.0 / float(temperature))).T.astype(jnp.bfloat16)  # (D, P)

    anchors3 = anchors.reshape(num_views, B, D)

    if tile_rows is None:
        tile_rows = _pick_tile_rows(B, P)
    assert B % tile_rows == 0
    num_b_tiles = B // tile_rows
    num_tiles = num_views * num_b_tiles

    ce_parts, colsum_parts = pl.pallas_call(
        _msn_anchor_kernel,
        out_shape=(
            jax.ShapeDtypeStruct((num_tiles, 1, 128), jnp.float32),   # ce partials
            jax.ShapeDtypeStruct((num_tiles, 1, P), jnp.float32),     # colsum partials
        ),
        grid=(num_views, num_b_tiles),
        in_specs=[
            pl.BlockSpec((1, tile_rows, D), lambda v, b: (v, b, 0)),  # anchors (V,B,D)
            pl.BlockSpec((tile_rows, P), lambda v, b: (b, 0)),        # q (B,P) bf16
            pl.BlockSpec((D, P), lambda v, b: (0, 0)),                # ps (D,P) bf16
        ],
        out_specs=(
            pl.BlockSpec((1, 1, 128), _part_index(num_b_tiles)),
            pl.BlockSpec((1, 1, P), _part_index(num_b_tiles)),
        ),
        compiler_params=pltpu.CompilerParams(
            dimension_semantics=("parallel", "parallel"),
            vmem_limit_bytes=_vmem_limit_bytes(tile_rows, B, P, D),
        ),
        cost_estimate=pl.CostEstimate(
            flops=2 * A * P * D,
            transcendentals=A * (P + 1),
            bytes_accessed=(4 * A * D + 2 * num_views * B * P + 2 * D * P
                            + 4 * num_tiles * (P + 128)),
        ),
    )(anchors3, q_bf16, ps_t)

    # ---- tiny reductions / regularizer in the wrapper (plain XLA) ----
    inv_a = 1.0 / float(A)
    loss = jnp.sum(ce_parts[:, 0, 0]) * inv_a
    if regularization_weight > 0:
        mean_ap = jnp.sum(colsum_parts[:, 0, :], axis=0) * inv_a          # (P,)
        reg = jnp.sum(mean_ap * jnp.log(mean_ap)) + math.log(float(P))
        loss = loss + regularization_weight * reg
    return loss


# --------------------------------------------------------------------------- #
# Pure-JAX reference (mirrors the PyTorch module) for verification             #
# --------------------------------------------------------------------------- #
def msn_loss_ref(anchors, targets, prototypes, *,
                 temperature=0.1, sinkhorn_iterations=3, regularization_weight=1.0,
                 target_sharpen_temperature=0.25):
    num_views = anchors.shape[0] // targets.shape[0]
    B, P = targets.shape[0], prototypes.shape[0]

    def norm(x):
        return x / jnp.maximum(jnp.linalg.norm(x, axis=1, keepdims=True), 1e-12)

    a, t, p = norm(anchors), norm(targets), norm(prototypes)
    ap = jax.nn.softmax(a @ p.T / temperature, axis=1)
    tp = jax.nn.softmax(t @ p.T / temperature, axis=1)
    tp = tp ** (1.0 / target_sharpen_temperature)
    tp = tp / jnp.sum(tp, axis=1, keepdims=True)
    q = tp / jnp.sum(tp)
    for _ in range(sinkhorn_iterations):
        q = q / jnp.sum(q, axis=0, keepdims=True) / P
        q = q / jnp.sum(q, axis=1, keepdims=True) / B
    q = q * B
    q_rep = jnp.tile(q, (num_views, 1))
    loss = jnp.mean(jnp.sum(-q_rep * jnp.log(ap), axis=1))
    if regularization_weight > 0:
        m = jnp.mean(ap, axis=0)
        loss = loss + regularization_weight * (jnp.sum(m * jnp.log(m)) + math.log(float(P)))
    return loss


if __name__ == "__main__":
    key = jax.random.PRNGKey(0)
    k1, k2, k3 = jax.random.split(key, 3)

    batch = 8
    views = 2
    dim = 128
    num_prototypes = 128

    anchors = jax.random.normal(k1, (batch * views, dim), dtype=jnp.float32)
    targets = jax.random.normal(k2, (batch, dim), dtype=jnp.float32)
    # prototypes would be an nn.Parameter in the model; init deterministically here.
    prototypes = jax.random.normal(k3, (num_prototypes, dim), dtype=jnp.float32)

    loss = msn_loss(anchors, targets, prototypes)
    jax.block_until_ready(loss)

    ref = msn_loss_ref(anchors, targets, prototypes)
    # bf16 MXU operands + bf16 q storage -> loosened (deliberately) from 1e-4.
    assert jnp.allclose(loss, ref, rtol=3e-3, atol=3e-3), (float(loss), float(ref))

    print("KERNEL_OK")
</pallas_src>

<mosaic_0001>
module attributes {stable_mosaic.version = 11 : i64} {
  func.func @_msn_anchor_kernel(%arg0: i32, %arg1: i32, %arg2: memref<1x8x128xf32, #tpu.memory_space<vmem>>, %arg3: memref<8x128xbf16, #tpu.memory_space<vmem>>, %arg4: memref<128x128xbf16, #tpu.memory_space<vmem>>, %arg5: memref<1x1x128xf32, #tpu.memory_space<vmem>>, %arg6: memref<1x1x128xf32, #tpu.memory_space<vmem>>) attributes {dimension_semantics = [#tpu.dimension_semantics<parallel>, #tpu.dimension_semantics<parallel>], iteration_bounds = array<i64: 2, 1>, scalar_prefetch = 0 : i64, scratch_operands = 0 : i64, tpu.core_type = #tpu.core_type<tc>, window_params = [{transform_indices = @transform_0, window_bounds = array<i64: 1, 8, 128>}, {transform_indices = @transform_1, window_bounds = array<i64: 8, 128>}, {pipeline_mode = #tpu.pipeline_mode<synchronous>, transform_indices = @transform_2, window_bounds = array<i64: 128, 128>}, {transform_indices = @transform_3, window_bounds = array<i64: 1, 1, 128>}, {transform_indices = @transform_4, window_bounds = array<i64: 1, 1, 128>}]} {
    %c0 = arith.constant 0 : index
    %c0_0 = arith.constant 0 : index
    %c0_1 = arith.constant 0 : index
    %0 = vector.load %arg2[%c0, %c0_0, %c0_1] : memref<1x8x128xf32, #tpu.memory_space<vmem>>, vector<1x8x128xf32>
    %1 = vector.shape_cast %0 : vector<1x8x128xf32> to vector<8x128xf32>
    %2 = arith.mulf %1, %1 : vector<8x128xf32>
    %cst = arith.constant dense<0.000000e+00> : vector<8xf32>
    %3 = vector.multi_reduction <add>, %2, %cst [1] : vector<8x128xf32> to vector<8xf32>
    %4 = vector.shape_cast %3 : vector<8xf32> to vector<8x1xf32>
    %cst_2 = arith.constant 1.000000e-24 : f32
    %5 = vector.broadcast %cst_2 : f32 to vector<8x1xf32>
    %6 = arith.maximumf %4, %5 : vector<8x1xf32>
    %7 = math.rsqrt %6 : vector<8x1xf32>
    %8 = vector.broadcast %7 : vector<8x1xf32> to vector<8x128xf32>
    %9 = arith.mulf %1, %8 : vector<8x128xf32>
    %10 = arith.truncf %9 : vector<8x128xf32> to vector<8x128xbf16>
    %c0_3 = arith.constant 0 : index
    %c0_4 = arith.constant 0 : index
    %11 = vector.load %arg4[%c0_3, %c0_4] : memref<128x128xbf16, #tpu.memory_space<vmem>>, vector<128x128xbf16>
    %cst_5 = arith.constant dense<0.000000e+00> : vector<8x128xf32>
    %12 = tpu.matmul %10, %11, %cst_5 {dimension_numbers = #tpu.dot_dimension_numbers<[1], [0], [0], [1], [0, 0, 1, 1], [], []>} : vector<8x128xbf16>, vector<128x128xbf16>, vector<8x128xf32> -> vector<8x128xf32>
    %cst_6 = arith.constant dense<0xFF800000> : vector<8xf32>
    %13 = vector.multi_reduction <maximumf>, %12, %cst_6 [1] : vector<8x128xf32> to vector<8xf32>
    %14 = vector.shape_cast %13 : vector<8xf32> to vector<8x1xf32>
    %15 = vector.broadcast %14 : vector<8x1xf32> to vector<8x128xf32>
    %16 = arith.subf %12, %15 : vector<8x128xf32>
    %17 = math.exp %16 : vector<8x128xf32>
    %cst_7 = arith.constant dense<0.000000e+00> : vector<8xf32>
    %18 = vector.multi_reduction <add>, %17, %cst_7 [1] : vector<8x128xf32> to vector<8xf32>
    %19 = vector.shape_cast %18 : vector<8xf32> to vector<8x1xf32>
    %20 = math.log %19 : vector<8x1xf32>
    %21 = vector.broadcast %20 : vector<8x1xf32> to vector<8x128xf32>
    %22 = arith.subf %16, %21 : vector<8x128xf32>
    %cst_8 = arith.constant 1.000000e+00 : f32
    %23 = vector.broadcast %cst_8 : f32 to vector<8x1xf32>
    %24 = arith.divf %23, %19 : vector<8x1xf32>
    %25 = vector.broadcast %24 : vector<8x1xf32> to vector<8x128xf32>
    %26 = arith.mulf %17, %25 : vector<8x128xf32>
    %cst_9 = arith.constant dense<0.000000e+00> : vector<128xf32>
    %27 = vector.multi_reduction <add>, %26, %cst_9 [0] : vector<8x128xf32> to vector<128xf32>
    %28 = vector.shape_cast %27 : vector<128xf32> to vector<1x128xf32>
    %c0_10 = arith.constant 0 : index
    %c0_11 = arith.constant 0 : index
    %c0_12 = arith.constant 0 : index
    %29 = vector.load %arg6[%c0_10, %c0_11, %c0_12] : memref<1x1x128xf32, #tpu.memory_space<vmem>>, vector<1x1x128xf32>
    %30 = vector.shape_cast %29 : vector<1x1x128xf32> to vector<1x128xf32>
    %31 = vector.shape_cast %28 : vector<1x128xf32> to vector<1x1x128xf32>
    tpu.vector_store %arg6[%c0_10, %c0_11, %c0_12], %31 {strides = array<i32>} : memref<1x1x128xf32, #tpu.memory_space<vmem>>, vector<1x1x128xf32>,
    %c0_13 = arith.constant 0 : index
    %c0_14 = arith.constant 0 : index
    %32 = vector.load %arg3[%c0_13, %c0_14] : memref<8x128xbf16, #tpu.memory_space<vmem>>, vector<8x128xbf16>
    %33 = arith.extf %32 : vector<8x128xbf16> to vector<8x128xf32>
    %34 = arith.mulf %33, %22 : vector<8x128xf32>
    %cst_15 = arith.constant 0.000000e+00 : f32
    %35 = vector.broadcast %cst_15 : f32 to vector<8x128xf32>
    %36 = arith.subf %35, %34 : vector<8x128xf32>
    %cst_16 = arith.constant dense<0.000000e+00> : vector<128xf32>
    %37 = vector.multi_reduction <add>, %36, %cst_16 [0] : vector<8x128xf32> to vector<128xf32>
    %38 = vector.shape_cast %37 : vector<128xf32> to vector<1x128xf32>
    %cst_17 = arith.constant dense<0.000000e+00> : vector<1xf32>
    %39 = vector.multi_reduction <add>, %38, %cst_17 [1] : vector<1x128xf32> to vector<1xf32>
    %40 = vector.shape_cast %39 : vector<1xf32> to vector<1x1xf32>
    %41 = vector.shape_cast %40 : vector<1x1xf32> to vector<1x1xf32>
    %42 = vector.broadcast %41 : vector<1x1xf32> to vector<1x128xf32>
    %c0_18 = arith.constant 0 : index
    %c0_19 = arith.constant 0 : index
    %c0_20 = arith.constant 0 : index
    %43 = vector.load %arg5[%c0_18, %c0_19, %c0_20] : memref<1x1x128xf32, #tpu.memory_space<vmem>>, vector<1x1x128xf32>
    %44 = vector.shape_cast %43 : vector<1x1x128xf32> to vector<1x128xf32>
    %45 = vector.shape_cast %42 : vector<1x128xf32> to vector<1x1x128xf32>
    tpu.vector_store %arg5[%c0_18, %c0_19, %c0_20], %45 {strides = array<i32>} : memref<1x1x128xf32, #tpu.memory_space<vmem>>, vector<1x1x128xf32>,
    return
  }
  func.func @transform_0(%arg0: i32, %arg1: i32) -> (i32, i32, i32) {
    %c0_i32 = arith.constant 0 : i32
    %c0_i32_0 = arith.constant 0 : i32
    return %arg0, %arg1, %c0_i32 : i32, i32, i32
  }
  func.func @transform_1(%arg0: i32, %arg1: i32) -> (i32, i32) {
    %c0_i32 = arith.constant 0 : i32
    %c0_i32_0 = arith.constant 0 : i32
    return %arg1, %c0_i32 : i32, i32
  }
  func.func @transform_2(%arg0: i32, %arg1: i32) -> (i32, i32) {
    %c0_i32 = arith.constant 0 : i32
    %c0_i32_0 = arith.constant 0 : i32
    %c0_i32_1 = arith.constant 0 : i32
    return %c0_i32, %c0_i32_0 : i32, i32
  }
  func.func @transform_3(%arg0: i32, %arg1: i32) -> (i32, i32, i32) {
    %c1_i32 = arith.constant 1 : i32
    %0 = arith.muli %arg0, %c1_i32 : i32
    %1 = arith.addi %0, %arg1 : i32
    %c0_i32 = arith.constant 0 : i32
    %c0_i32_0 = arith.constant 0 : i32
    %c0_i32_1 = arith.constant 0 : i32
    return %1, %c0_i32, %c0_i32_0 : i32, i32, i32
  }
  func.func @transform_4(%arg0: i32, %arg1: i32) -> (i32, i32, i32) {
    %c1_i32 = arith.constant 1 : i32
    %0 = arith.muli %arg0, %c1_i32 : i32
    %1 = arith.addi %0, %arg1 : i32
    %c0_i32 = arith.constant 0 : i32
    %c0_i32_0 = arith.constant 0 : i32
    %c0_i32_1 = arith.constant 0 : i32
    return %1, %c0_i32, %c0_i32_0 : i32, i32, i32
  }
}

</mosaic_0001>

<bundles_post_ra>
// kernel: tpu_custom_call.1
= control target key start
LH: loop header
LB: loop body
LE: loop exit
PB: predicated region body
PF: predicated region fallthrough
CT: control target
= control target key end

     0   :  { %10 = vsyncpa [#allocation3], 0  ;;  %s1254_s0 = inlined_call_operand.hbm [shape: f32[2,8,128], index: 0, kind: input, shape index: {}]   ;;  %s1255_s1 = inlined_call_operand.hbm [shape: bf16[8,128], index: 1, kind: input, shape index: {}]   ;;  %s1256_s2 = inlined_call_operand.hbm [shape: bf16[128,128], index: 2, kind: input, shape index: {}]   ;;  %s1257_s3 = inlined_call_operand.hbm [shape: f32[2,1,128], index: 3, kind: output, shape index: {0}]   ;;  %s1258_s4 = inlined_call_operand.hbm [shape: f32[2,1,128], index: 4, kind: output, shape index: {1}]  }
   0x1   :  { %12 = vsyncpa [#allocation3 + $0x1], 0 }
   0x2   :  { %13 = vsyncpa [#allocation6], 0 }
   0x3   :  { %14 = vsyncpa [#allocation4], 0 }
   0x4   :  { %16 = vsyncpa [#allocation4 + $0x1], 0 }
   0x5   :  { %17 = vsyncpa [#allocation10], 0 }
   0x6   :  { %19 = vsyncpa [#allocation10 + $0x1], 0  ;;  %s982_s15 = smov 0   ;;  %s984_s16 = smov 0  }
   0x7   :  { %s986_s17 = smov 0   ;;  %s988_s18 = smov 0  }
   0x8   :  { %s990_s19 = smov 0   ;;  %s992_s20 = smov 0  }
   0x9 LB: > { %s581_s21 = sadd.s32 4294967295, %s946_s20   ;;  %s582_s22 = sadd.s32 4294967294, %s946_s20   ;;  %s946_s20 = sphi %s992_s20, %s25_s20   ;;  %s942_s19 = sphi %s990_s19, %s1281_s19   ;;  %s938_s18 = sphi %s988_s18, %s1280_s18   ;;  %s934_s17 = sphi %s986_s17, %s1279_s17   ;;  %s930_s16 = sphi %s984_s16, %s1278_s16   ;;  %s926_s15 = sphi %s982_s15, %s1277_s15  }
   0xa   : > { %p59_p0 = scmp.ne.s32.totalorder %s930_s16, %s926_s15  ;;  %p1016_p1 = scmp.eq.s32.totalorder %s581_s21, 0 }
   0xb   : > { %p1020_p2 = scmp.eq.s32.totalorder %s581_s21, 1  ;;  %p138_p3 = scmp.eq.s32.totalorder %s582_s22, 1 }
   0xc   : > { %s1263_s23 = scalar_select %p1016_p1, 1, 0 }
   0xd   : > { %s1264_s24 = scalar_select %p1020_p2, 1, 0 }
   0xe   : > { %p1026_p4 = por %p1016_p1, %p59_p0  ;;  %p583_p5 = scmp.ge.s32.totalorder %s946_s20, 1 }
   0xf   : > { %p1031_p6 = por %p138_p3, %p59_p0  ;;  %p173_p7 = scmp.lt.s32.totalorder %s946_s20, 3 }
  0x10   : > { %s1265_s25 = scalar_select %p1026_p4, 1, 0 }
  0x11   : > { %s1266_s26 = scalar_select %p1031_p6, 1, 0 }
  0x12   : > { %p1036_p8 = pnand %p583_p5, %p173_p7  ;;  %s948_s28 = smov [#allocation5]  }
  0x13   : > { %s188_s29 = sshll.u32 %s948_s28, 4  ;;  %s949_s30 = smov [#allocation7]   ;;  %s189_s29 = int_to_ptr.vmem [resolvable:$true] %s188_s29 }
  0x14   : > { %s1267_s27 = scalar_select %p1036_p8, 1, 0 }
  0x15   : > { %p648_p10 = pneg %p1036_p8  ;;  %s198_s5 = sshll.u32 %s949_s30, 4  ;;  %s1049_s5 = int_to_ptr.vmem [resolvable:$true] %s198_s5 }
  0x16   : > { %s742_s9 = scalar_lea.hbm %s1255_s1, 64 }
  0x17   : > { %p1045_p11 = pnand %p648_p10, %p1016_p1  ;;  %p743_p12 = scmp.ne.s32.totalorder %s1255_s1, %s742_s9 }
  0x18   : > { %p749_p5 = scmp.lt.u32.totalorder %s742_s9, %s1255_s1 }
  0x19   : > { %p744_p13 = pneg %p1045_p11 }
  0x1b   : > { %p745_p0 = pnand %p744_p13, %p743_p12 }
  0x1d   : > { %p746_p3 = pneg %p745_p0 }
  0x1f   : > { %p751_p7 = pnand %p749_p5, %p746_p3 }
  0x21   : > { %754 = shalt.err (!%p751_p7)
}
  0x22   : > { %s755_s14 = scalar_lea.vmem %s189_s29, 64  ;;  %p763_p1 = scmp.lt.s32.totalorder %s189_s29, %s189_s29 }
  0x23   : > { %p756_p10 = scmp.ne.s32.totalorder %s189_s29, %s755_s14  ;;  %p764_p4 = scmp.lt.s32.totalorder %s755_s14, %s755_s14 }
  0x25   : > { %p758_p9 = pnand %p756_p10, %p744_p13  ;;  %p765_p8 = por %p764_p4, %p763_p1 }
  0x27   : > { %p759_p6 = pneg %p758_p9 }
  0x29   : > { %p766_p2 = pnand %p765_p8, %p759_p6 }
  0x2b   : > { %769 = shalt.err (!%p766_p2)
}
  0x2c   : > { %651 = dma.hbm_to_vmem [thread:$0]  (!%p1045_p11), %s1255_s1, 64, %s189_s29, [#allocation6]  }
  0x2d   : > { %s770_s7 = scalar_lea.hbm %s1256_s2, 1024 }
  0x2e   : > { %p771_p9 = scmp.ne.s32.totalorder %s1256_s2, %s770_s7  ;;  %p777_p2 = scmp.lt.u32.totalorder %s770_s7, %s1256_s2 }
  0x30   : > { %p773_p1 = pnand %p771_p9, %p744_p13 }
  0x32   : > { %p774_p4 = pneg %p773_p1 }
  0x34   : > { %p779_p6 = pnand %p777_p2, %p774_p4 }
  0x36   : > { %782 = shalt.err (!%p779_p6)
}
  0x37   : > { %s783_s29 = scalar_lea.vmem %s1049_s5, 1024  ;;  %p791_p3 = scmp.lt.s32.totalorder %s1049_s5, %s1049_s5 }
  0x38   : > { %p784_p8 = scmp.ne.s32.totalorder %s1049_s5, %s783_s29  ;;  %p792_p5 = scmp.lt.s32.totalorder %s783_s29, %s783_s29 }
  0x3a   : > { %p786_p12 = pnand %p784_p8, %p744_p13  ;;  %p793_p7 = por %p792_p5, %p791_p3 }
  0x3c   : > { %p787_p0 = pneg %p786_p12 }
  0x3e   : > { %p794_p10 = pnand %p793_p7, %p787_p0 }
  0x40   : > { %797 = shalt.err (!%p794_p10)
}
  0x41   : > { %s950_s12 = smov 64   ;;  %s951_s13 = smov 4  }
  0x42   : > { %654 = dma.hbm_to_vmem [thread:$0]  (!%p1045_p11), %s1256_s2, 1024, %s1049_s5, [#allocation6], %s950_s12, %s950_s12, %s951_s13  }
  0x43   : > { %s37_s22 = sadd.s32 1, %s942_s19  ;;  %s46_s28 = sadd.s32 1, %s934_s17 }
  0x44   : > { %p39_p13 = scmp.ge.s32.totalorder %s37_s22, 2  ;;  %p53_p9 = scmp.ne.s32.totalorder %s934_s17, %s930_s16 }
  0x45   : > { %p54_p1 = scmp.eq.s32.totalorder %s946_s20, 0  ;;  %p668_p4 = scmp.lt.s32.totalorder %s946_s20, 2 }
  0x46   : > { %s1283_s22 = smov (%p39_p13, %s37_s22), 0  ;;  %p1269_p6 = scmp.ne.s32.totalorder %s1264_s24, 0 }
  0x47   : > { %p55_p2 = por %p54_p1, %p53_p9  ;;  %s41_s6 = ssub.s32 %s942_s19, %s1283_s22 }
  0x48   : > { %p1108_p8 = por %p1269_p6, %p53_p9  ;;  %s212_s7 = sand.u32 1, %s934_s17  }
  0x49   : > { %p44_p12 = scmp.eq.s32.totalorder %s41_s6, 0  ;;  %s587_s5 = sshll.u32 %s212_s7, 3 }
  0x4a   : > { %s588_s8 = sshll.u32 %s942_s19, 7  ;;  %s216_s24 = scalar_lea.vmem [#allocation2], %s587_s5 }
  0x4b   : > { %s1117_s9 = scalar_select %p44_p12, %s934_s17, %s46_s28  }
  0x4c   : > { %s1122_s29 = scalar_lea.hbm %s1254_s0, %s588_s8  ;;  %s224_s12 = sshll.u32 %s216_s24, 4  ;;  %s1130_s12 = int_to_ptr.vmem [resolvable:$true] %s224_s12 }
  0x4d   : > { %p1126_p11 = pnand %p668_p4, %p55_p2  ;;  %s213_s14 = scalar_lea.sflag [#allocation3], %s212_s7 }
  0x4e   : > { %s798_s21 = scalar_lea.hbm %s1122_s29, 128  ;;  %s803_s5 = scalar_lea.hbm %s1254_s0, 256 }
  0x4f   : > { %p799_p0 = scmp.ne.s32.totalorder %s1122_s29, %s798_s21  ;;  %p800_p3 = pneg %p1126_p11 }
  0x50   : > { %p804_p10 = scmp.lt.u32.totalorder %s1122_s29, %s1254_s0  ;;  %p805_p13 = scmp.lt.u32.totalorder %s803_s5, %s798_s21 }
  0x51   : > { %p801_p5 = pnand %p800_p3, %p799_p0  ;;  %p807_p1 = scmp.lt.u32.totalorder %s798_s21, %s1122_s29 }
  0x52   : > { %p806_p9 = por %p805_p13, %p804_p10 }
  0x53   : > { %p802_p7 = pneg %p801_p5 }
  0x54   : > { %p808_p4 = por %p807_p1, %p806_p9 }
  0x56   : > { %p809_p2 = pnand %p808_p4, %p802_p7 }
  0x58   : > { %812 = shalt.err (!%p809_p2)
}
  0x59   : > { %s813_s7 = scalar_lea.vmem %s1130_s12, 128  ;;  %s952_s11 = smov [#allocation2]  }
  0x5a   : > { %p814_p6 = scmp.ne.s32.totalorder %s1130_s12, %s813_s7  ;;  %s818_s24 = sshll.u32 %s952_s11, 4  ;;  %s819_s24 = int_to_ptr.vmem [resolvable:$false] %s818_s24 }
  0x5b   : > { %s820_s28 = scalar_lea.vmem %s819_s24, 256  ;;  %p821_p5 = scmp.lt.s32.totalorder %s1130_s12, %s819_s24 }
  0x5c   : > { %p816_p12 = pnand %p814_p6, %p800_p3  ;;  %p822_p10 = scmp.lt.s32.totalorder %s820_s28, %s813_s7 }
  0x5e   : > { %p817_p0 = pneg %p816_p12  ;;  %p823_p13 = por %p822_p10, %p821_p5 }
  0x60   : > { %p824_p9 = pnand %p823_p13, %p817_p0 }
  0x62   : > { %827 = shalt.err (!%p824_p9)
}
  0x63   : > { %658 = dma.hbm_to_vmem [thread:$0]  (!%p1126_p11), %s1122_s29, 128, %s1130_s12, %s213_s14  }
  0x64   : > { %p1272_p7 = scmp.ne.s32.totalorder %s1267_s27, 0 }
  0x65   : > { %s1160_s21 = sand.u32 (!%p1272_p7), 1, %s930_s16   ;;  %p1273_p3 = scmp.ne.s32.totalorder (!%p1272_p7), %s1265_s25, 0 }
  0x66   : > { %233 = sbr.rel (%p1272_p7) target bundleno = 973 (0x3cd), region = 32  ;;  %s590_s6 = sshll.u32 (!%p1272_p7), %s1160_s21, 3 }
  0x67   : > { %s236_s5 = scalar_lea.sflag (!%p1272_p7), [#allocation3], %s1160_s21  ;;  %s239_s8 = scalar_lea.vmem (!%p1272_p7), [#allocation2], %s590_s6 }
  0x6d   : > { %909 = dma.done.wait (%p1273_p3), %s236_s5, 128  }
  0x6e   : > { %911 = vsyncadd (%p1273_p3), %s236_s5, 4294967168  ;;  %p1274_p1 = scmp.ne.s32.totalorder %s1263_s23, 0 }
  0x70   : > { %913 = dma.done.wait (%p1274_p1), [#allocation6], 1088  }
  0x71   : > { %915 = vsyncadd (%p1274_p1), [#allocation6], 4294966208  ;;  %v953_v0 = vmov 0.0   ;;  %v278_v1 = vld [vmem:[%s239_s8] sm:$0xff]  ;;  %v726_v3 = vld [vmem:[#allocation7] sm:$0xff]   ;;  %vm954_vm0 = vmmov 0  }
  0x72   : > { %614 = vmatprep.subr.bf16.mxu0 %v953_v0  ;;  %v279_v2 = vmul.f32 %v278_v1, %v278_v1  ;;  %v727_v4 = vld [vmem:[#allocation7 + $0x8] sm:$0xff]   ;;  %v728_v5 = vld [vmem:[#allocation7 + $0x10] sm:$0xff]   ;;  %v729_v6 = vld [vmem:[#allocation7 + $0x18] sm:$0xff]   ;;  %630 = vmatprep.mubr.msk.bf16.mxu0 %vm954_vm0, %v953_v0  ;;  %s274_s23 = scalar_lea.vmem [#allocation9], %s1160_s21  ;;  %s601_s25 = sshll.u32 %s938_s18, 4 }
  0x73   : > { %615 = vmatpush3.bf16.msra.mxu0 %v726_v3  ;;  %v730_v7 = vld [vmem:[#allocation7 + $0x20] sm:$0xff]   ;;  %v731_v8 = vld [vmem:[#allocation7 + $0x28] sm:$0xff]   ;;  %v732_v9 = vld [vmem:[#allocation7 + $0x30] sm:$0xff]   ;;  %s1179_s12 = scalar_lea.hbm %s1258_s4, %s601_s25  ;;  %s455_s13 = sshll.u32 %s274_s23, 4  ;;  %s456_s13 = int_to_ptr.vmem [resolvable:$true] %s455_s13 }
  0x74   : > { %280 = vadd.xlane.f32.xlu0 %v279_v2  ;;  %616 = vmatprep.subr.bf16.mxu0 %v953_v0  ;;  %v733_v10 = vld [vmem:[#allocation7 + $0x38] sm:$0xff]   ;;  %s428_s14 = scalar_lea.sflag [#allocation10], %s1160_s21  ;;  %s828_s10 = scalar_lea.vmem %s456_s13, 16 }
  0x75   : > { %v410_v25 = vld [vmem:[#allocation5] sm:$0xf]  ;;  %p829_p11 = scmp.ne.s32.totalorder %s456_s13, %s828_s10  ;;  %s955_s7 = smov [#allocation9]  }
  0x76   : > { %v411_v29 = vunpack.c.l.bf16 %v410_v25  ;;  %s832_s11 = sshll.u32 %s955_s7, 4  ;;  %s833_s11 = int_to_ptr.vmem [resolvable:$false] %s832_s11 }
  0x77   : > { %617 = vmatpush3.bf16.msra.mxu0 %v727_v4  ;;  %p830_p4 = pnand %p829_p11, %p1108_p8  ;;  %s834_s24 = scalar_lea.vmem %s833_s11, 32 }
  0x78   : > { %618 = vmatprep.subr.bf16.mxu0 %v953_v0  ;;  %p835_p6 = scmp.lt.s32.totalorder %s456_s13, %s833_s11  ;;  %p836_p12 = scmp.lt.s32.totalorder %s834_s24, %s828_s10 }
  0x79   : > { %p831_p2 = pneg %p830_p4 }
  0x7a   : > { %p837_p0 = por %p836_p12, %p835_p6 }
  0x7b   : > { %619 = vmatpush3.bf16.msra.mxu0 %v728_v5 }
  0x7c   : > { %620 = vmatprep.subr.bf16.mxu0 %v953_v0  ;;  %p838_p5 = pnand %p837_p0, %p831_p2 }
  0x7f   : > { %621 = vmatpush3.bf16.msra.mxu0 %v729_v6 }
  0x80   : > { %622 = vmatprep.subr.bf16.mxu0 %v953_v0 }
  0x83   : > { %623 = vmatpush3.bf16.msra.mxu0 %v730_v7 }
  0x84   : > { %624 = vmatprep.subr.bf16.mxu0 %v953_v0 }
  0x87   : > { %625 = vmatpush3.bf16.msra.mxu0 %v731_v8 }
  0x88   : > { %626 = vmatprep.subr.bf16.mxu0 %v953_v0 }
  0x8b   : > { %627 = vmatpush3.bf16.msra.mxu0 %v732_v9 }
  0x8c   : > { %628 = vmatprep.subr.bf16.mxu0 %v953_v0 }
  0x8f   : > { %629 = vmatpush3.bf16.msra.mxu0 %v733_v10 }
 0x101   : > { %v281_v11 = vpop.xlane.xlu0 %280 }
 0x102   : > { %v282_v12 = vmax.f32 %v281_v11, 1e-24 }
 0x104   : > { %734 = vrsqrt.f32 %v282_v12 }
 0x10e   : > { %v735_v13 = vpop.eup %734 }
 0x10f   : > { %v284_v14 = vmul.f32 %v735_v13, %v278_v1 }
 0x111   : > { %v285_v15 = vpack.c.bf16 %v284_v14, %v284_v14 }
 0x113   : > { %631 = vmatmul.mubr.bf16.vlgmr.msra.gmra.mrb[0].mxu0 %v285_v15 }
 0x1e6   : > { %v384_v16 = vpop.f32.mrb[0].mxu0 }
 0x1e7   : > { %390 = vmax.xlane.f32.xlu0 %v384_v16  ;;  %v632_v17 = vpop.f32.mrb[1].mxu0 }
 0x1e8   : > { %v387_v18 = vpop.f32.mrb[2].mxu0 }
 0x1e9   : > { %v633_v19 = vpop.f32.mrb[3].mxu0 }
 0x274   : > { %v391_v20 = vpop.xlane.xlu0 %390 }
 0x275   : > { %v392_v21 = vsub.f32 %v384_v16, %v391_v20 }
 0x277   : > { %v393_v22 = vmul.f32 1.442695, %v392_v21 }
 0x279   : > { %736 = vpow2.f32 %v393_v22 }
 0x283   : > { %v737_v23 = vpop.eup %736 }
 0x284   : > { %395 = vadd.xlane.f32.xlu1 %v737_v23 }
 0x311   : > { %v396_v24 = vpop.xlane.xlu1 %395 }
 0x312   : > { %738 = vlog2.f32 %v396_v24 }
 0x313   : > { %740 = vrcp.f32 %v396_v24 }
 0x31c   : > { %v739_v26 = vpop.eup %738 }
 0x31d   : > { %v741_v27 = vpop.eup %740  ;;  %v398_v28 = vmul.f32 0.6931472, %v739_v26 }
 0x31e   : > { %v402_v30 = vmul.f32 %v741_v27, %v737_v23 }
 0x31f   : > { %v399_v31 = vsub.f32 %v392_v21, %v398_v28 }
 0x320   : > { %v403_v32 = vrot.slane %v402_v30, 4 }
 0x321   : > { %v412_v33 = vmul.f32 %v411_v29, %v399_v31 }
 0x322   : > { %v404_v34 = vadd.f32 %v403_v32, %v402_v30 }
 0x323   : > { %v413_v35 = vsub.f32 0.0, %v412_v33 }
 0x324   : > { %v405_v36 = vrot.slane %v404_v34, 2 }
 0x325   : > { %v414_v37 = vrot.slane %v413_v35, 4 }
 0x326   : > { %v406_v38 = vadd.f32 %v405_v36, %v404_v34 }
 0x327   : > { %v415_v39 = vadd.f32 %v414_v37, %v413_v35 }
 0x328   : > { %v407_v40 = vrot.slane %v406_v38, 1 }
 0x329   : > { %v416_v41 = vrot.slane %v415_v39, 2 }
 0x32a   : > { %v408_v42 = vadd.f32 %v407_v40, %v406_v38 }
 0x32b   : > { %v417_v43 = vadd.f32 %v416_v41, %v415_v39 }
 0x32c   : > { %409 = vst [vmem:[%s274_s23] sm:$0x1] %v408_v42 }
 0x32d   : > { %v418_v44 = vrot.slane %v417_v43, 1 }
 0x32f   : > { %v419_v45 = vadd.f32 %v418_v44, %v417_v43 }
 0x331   : > { %420 = vadd.xlane.f32.xlu1 %v419_v45 }
 0x332   : > { %841 = shalt.err (!%p838_p5)
}
 0x333   : > { %s842_s28 = scalar_lea.hbm %s1179_s12, 16  ;;  %s846_s8 = scalar_lea.hbm %s1258_s4, 32 }
 0x334   : > { %p843_p10 = scmp.ne.s32.totalorder %s1179_s12, %s842_s28  ;;  %p847_p7 = scmp.lt.u32.totalorder %s1179_s12, %s1258_s4 }
 0x335   : > { %p848_p3 = scmp.lt.u32.totalorder %s846_s8, %s842_s28  ;;  %p850_p11 = scmp.lt.u32.totalorder %s842_s28, %s1179_s12 }
 0x336   : > { %p844_p13 = pnand %p843_p10, %p1108_p8 }
 0x337   : > { %p849_p1 = por %p848_p3, %p847_p7 }
 0x338   : > { %p845_p9 = pneg %p844_p13 }
 0x339   : > { %p851_p4 = por %p850_p11, %p849_p1 }
 0x33b   : > { %p852_p2 = pnand %p851_p4, %p845_p9 }
 0x33d   : > { %855 = shalt.err (!%p852_p2)
}
 0x33e   : > { %645 = dma.vmem_to_hbm [thread:$0]  (%p1108_p8), %s456_s13, 16, %s1179_s12, %s428_s14  }
 0x33f   : > { %s268_s29 = scalar_lea.vmem [#allocation8], %s1160_s21  ;;  %s1207_s24 = scalar_lea.hbm %s1257_s3, %s601_s25 }
 0x340   : > { %s441_s10 = sshll.u32 %s268_s29, 4  ;;  %s424_s28 = scalar_lea.sflag [#allocation4], %s1160_s21  ;;  %s1200_s10 = int_to_ptr.vmem [resolvable:$true] %s441_s10 }
 0x341   : > { %s856_s6 = scalar_lea.vmem %s1200_s10, 16  ;;  %s956_s12 = smov [#allocation8]  }
 0x342   : > { %p857_p6 = scmp.ne.s32.totalorder %s1200_s10, %s856_s6  ;;  %s860_s13 = sshll.u32 %s956_s12, 4  ;;  %s861_s13 = int_to_ptr.vmem [resolvable:$false] %s860_s13 }
 0x343   : > { %s862_s18 = scalar_lea.vmem %s861_s13, 32  ;;  %p863_p5 = scmp.lt.s32.totalorder %s1200_s10, %s861_s13 }
 0x344   : > { %p858_p12 = pnand %p857_p6, %p1108_p8  ;;  %p864_p10 = scmp.lt.s32.totalorder %s862_s18, %s856_s6 }
 0x346   : > { %p859_p0 = pneg %p858_p12  ;;  %p865_p13 = por %p864_p10, %p863_p5 }
 0x348   : > { %p866_p9 = pnand %p865_p13, %p859_p0 }
 0x3be   : > { %v421_v46 = vpop.xlane.xlu1 %420 }
 0x3bf   : > { %422 = vst [vmem:[%s268_s29] sm:$0x1] %v421_v46 }
 0x3c0   : > { %869 = shalt.err (!%p866_p9)
}
 0x3c1   : > { %s870_s21 = scalar_lea.hbm %s1207_s24, 16  ;;  %s874_s5 = scalar_lea.hbm %s1257_s3, 32 }
 0x3c2   : > { %p871_p7 = scmp.ne.s32.totalorder %s1207_s24, %s870_s21  ;;  %p875_p11 = scmp.lt.u32.totalorder %s1207_s24, %s1257_s3 }
 0x3c3   : > { %p876_p4 = scmp.lt.u32.totalorder %s874_s5, %s870_s21  ;;  %p878_p6 = scmp.lt.u32.totalorder %s870_s21, %s1207_s24 }
 0x3c4   : > { %p872_p3 = pnand %p871_p7, %p1108_p8 }
 0x3c5   : > { %p877_p2 = por %p876_p4, %p875_p11 }
 0x3c6   : > { %p873_p1 = pneg %p872_p3 }
 0x3c7   : > { %p879_p12 = por %p878_p6, %p877_p2 }
 0x3c9   : > { %p880_p0 = pnand %p879_p12, %p873_p1 }
 0x3cb   : > { %883 = shalt.err (!%p880_p0)
}
 0x3cc   : > { %644 = dma.vmem_to_hbm [thread:$0]  (%p1108_p8), %s1200_s10, 16, %s1207_s24, %s424_s28  }
 0x3cd PF: > { %s467_s27 = sand.u32 1, %s926_s15   ;;  %p1275_p5 = scmp.ne.s32.totalorder %s1266_s26, 0 }
 0x3ce   : > { %p1276_p10 = scmp.ge.s32.totalorder %s946_s20, 2  ;;  %s468_s29 = scalar_lea.sflag [#allocation4], %s467_s27 }
 0x3d0   : > { %p660_p13 = pnand %p1276_p10, %p1275_p5 }
 0x3d2   : > { %917 = dma.done.wait (!%p660_p13), %s468_s29, 16  }
 0x3d3   : > { %919 = vsyncadd (!%p660_p13), %s468_s29, 4294967280  ;;  %s476_s7 = scalar_lea.sflag [#allocation10], %s467_s27 }
 0x3d4   : > { %921 = dma.done.wait (!%p660_p13), %s476_s7, 16  }
 0x3d5   : > { %923 = vsyncadd (!%p660_p13), %s476_s7, 4294967280  ;;  %s25_s20 = sadd.s32 1, %s946_s20   ;;  %s1277_s15 = smov %s930_s16 }
 0x3d6   : > { %p22_p9 = scmp.ge.s32.totalorder %s25_s20, 4   ;;  %s1278_s16 = smov %s934_s17 }
 0x3d7   : > { %s1279_s17 = smov %s1117_s9  ;;  %s1280_s18 = smov %s942_s19 }
 0x3d8   : > { %s1281_s19 = smov %s1283_s22  ;;  %24 = sbr.rel (!%p22_p9) target bundleno = 9 (0x9), region = 103 }
 0x3df   :  { %480 = vsyncpa [#allocation3], 1 }
 0x3e0   :  { %482 = vsyncpa [#allocation3 + $0x1], 1 }
 0x3e1   :  { %483 = vsyncpa [#allocation6], 1 }
 0x3e2   :  { %484 = vsyncpa [#allocation4], 1 }
 0x3e3   :  { %486 = vsyncpa [#allocation4 + $0x1], 1 }
 0x3e4   :  { %487 = vsyncpa [#allocation10], 1 }
 0x3e5   :  { %489 = vsyncpa [#allocation10 + $0x1], 1 }

</bundles_post_ra>
